<compile_context>
chip_gen: v6e
topology: v6e:2x2x1
jax: 0.10.0
libtpu: 0.0.40
codegen_flags: <defaults>
</compile_context>

<pallas_src>
import functools

import jax
import jax.numpy as jnp
from jax.experimental import pallas as pl
from jax.experimental.pallas import tpu as pltpu

NEG_SLOPE = 0.2
BN_EPS = 1e-5


def _leaky_relu(x):
    return jnp.where(x > 0, x, NEG_SLOPE * x)


def encoder_kernel(x_ref, w1_ref, b1_ref, w2_ref, b2_ref, o_ref):
    # x tile: (TB, D).  BN1/BN2 are already folded into w1/b1/w2/b2.
    h = jnp.dot(x_ref[...], w1_ref[...],
                preferred_element_type=jnp.float32) + b1_ref[...]
    h = _leaky_relu(h)
    h = jnp.dot(h, w2_ref[...],
                preferred_element_type=jnp.float32) + b2_ref[...]
    o_ref[...] = _leaky_relu(h).astype(o_ref.dtype)


def _round_up(a, b):
    return ((a + b - 1) // b) * b


@functools.partial(jax.jit, static_argnames=("tile_b",))
def encoder_forward(x, params, tile_b=512):
    N, D = x.shape
    H1, H2 = 128, 32

    # ---- Fold BatchNorm (eval-mode running stats) into the Linear layers ----
    # (x*s1 + t1) @ W1^T + b1 == x @ (s1[:,None]*W1^T) + (t1 @ W1^T + b1)
    bn1_scale = params["bn1_gamma"] / jnp.sqrt(params["bn1_var"] + BN_EPS)
    bn1_shift = params["bn1_beta"] - params["bn1_mean"] * bn1_scale
    bn2_scale = params["bn2_gamma"] / jnp.sqrt(params["bn2_var"] + BN_EPS)
    bn2_shift = params["bn2_beta"] - params["bn2_mean"] * bn2_scale

    w1 = params["w1"].T * bn1_scale[:, None]                      # (D, 128)
    b1 = (bn1_shift @ params["w1"].T + params["b1"]).reshape(1, H1)
    w2 = params["w2"].T * bn2_scale[:, None]                      # (128, 32)
    b2 = (bn2_shift @ params["w2"].T + params["b2"]).reshape(1, H2)
    # Dropout(0.2) is identity in eval mode.

    # ---- Batch tiling with remainder handling ----
    # Effective tile: at most tile_b, at least enough to cover tiny batches,
    # always a multiple of 8 (sublane granularity).
    tile_eff = min(tile_b, _round_up(N, 8))
    n_pad = _round_up(N, tile_eff)
    if n_pad != N:
        x = jnp.pad(x, ((0, n_pad - N), (0, 0)))
    grid = (n_pad // tile_eff,)

    def bcast(shape):
        # Parameters: whole-array blocks, constant index -> stay VMEM-resident.
        return pl.BlockSpec(shape, lambda i: (0, 0))

    out = pl.pallas_call(
        encoder_kernel,
        out_shape=jax.ShapeDtypeStruct((n_pad, H2), jnp.float32),
        grid_spec=pl.GridSpec(
            grid=grid,
            in_specs=[
                pl.BlockSpec((tile_eff, D), lambda i: (i, 0)),   # x tile
                bcast((D, H1)), bcast((1, H1)),                  # w1, b1
                bcast((H1, H2)), bcast((1, H2)),                 # w2, b2
            ],
            out_specs=pl.BlockSpec((tile_eff, H2), lambda i: (i, 0)),
        ),
        compiler_params=pltpu.CompilerParams(
            dimension_semantics=("parallel",)),
    )(x, w1, b1, w2, b2)

    return out[:N]


def init_params(key, input_dim):
    """Deterministic synthetic parameters matching the PyTorch module's shapes."""
    ks = jax.random.split(key, 8)
    D, H1, H2 = input_dim, 128, 32
    lim1 = 1.0 / jnp.sqrt(D)
    lim2 = 1.0 / jnp.sqrt(H1)
    params = {
        "bn1_gamma": jax.random.uniform(ks[0], (D,), jnp.float32, 0.5, 1.5),
        "bn1_beta":  jax.random.uniform(ks[1], (D,), jnp.float32, -0.1, 0.1),
        "bn1_mean":  jax.random.uniform(ks[2], (D,), jnp.float32, -0.5, 0.5),
        "bn1_var":   jax.random.uniform(ks[3], (D,), jnp.float32, 0.5, 1.5),
        "w1": jax.random.uniform(ks[4], (H1, D), jnp.float32, -lim1, lim1),
        "b1": jax.random.uniform(ks[5], (H1,), jnp.float32, -lim1, lim1),
        "bn2_gamma": jax.random.uniform(ks[6], (H1,), jnp.float32, 0.5, 1.5),
        "bn2_beta":  jax.random.uniform(ks[7], (H1,), jnp.float32, -0.1, 0.1),
        "bn2_mean":  jnp.zeros((H1,), jnp.float32),
        "bn2_var":   jnp.ones((H1,), jnp.float32),
        "w2": jax.random.uniform(ks[4], (H2, H1), jnp.float32, -lim2, lim2),
        "b2": jax.random.uniform(ks[5], (H2,), jnp.float32, -lim2, lim2),
    }
    return params


def reference_forward(x, params):
    bn1_scale = params["bn1_gamma"] / jnp.sqrt(params["bn1_var"] + BN_EPS)
    bn1_shift = params["bn1_beta"] - params["bn1_mean"] * bn1_scale
    h = x * bn1_scale + bn1_shift
    h = h @ params["w1"].T + params["b1"]
    h = _leaky_relu(h)
    bn2_scale = params["bn2_gamma"] / jnp.sqrt(params["bn2_var"] + BN_EPS)
    bn2_shift = params["bn2_beta"] - params["bn2_mean"] * bn2_scale
    h = h * bn2_scale + bn2_shift
    h = h @ params["w2"].T + params["b2"]
    return _leaky_relu(h)


if __name__ == "__main__":
    key = jax.random.PRNGKey(0)
    k_x, k_x2, k_p = jax.random.split(key, 3)

    D = 64
    params = init_params(k_p, D)

    # Case 1: small batch (whole batch fits one tile).
    x = jax.random.normal(k_x, (16, D), jnp.float32)
    out = jax.block_until_ready(encoder_forward(x, params))
    ref = reference_forward(x, params)
    assert out.shape == (16, 32)
    assert jnp.allclose(out, ref, atol=1e-4, rtol=1e-5), "mismatch vs reference (case 1)"

    # Case 2: batch not divisible by the tile -> exercises padding + multi-step grid.
    x2 = jax.random.normal(k_x2, (40, D), jnp.float32)
    out2 = jax.block_until_ready(encoder_forward(x2, params, tile_b=16))
    ref2 = reference_forward(x2, params)
    assert out2.shape == (40, 32)
    assert jnp.allclose(out2, ref2, atol=1e-4, rtol=1e-5), "mismatch vs reference (case 2)"

    print("KERNEL_OK")
</pallas_src>

<mosaic_0001>
module attributes {stable_mosaic.version = 11 : i64} {
  func.func @encoder_kernel(%arg0: i32, %arg1: memref<16x64xf32, #tpu.memory_space<vmem>>, %arg2: memref<64x128xf32, #tpu.memory_space<vmem>>, %arg3: memref<1x128xf32, #tpu.memory_space<vmem>>, %arg4: memref<128x32xf32, #tpu.memory_space<vmem>>, %arg5: memref<1x32xf32, #tpu.memory_space<vmem>>, %arg6: memref<16x32xf32, #tpu.memory_space<vmem>>) attributes {dimension_semantics = [#tpu.dimension_semantics<parallel>], iteration_bounds = array<i64: 1>, scalar_prefetch = 0 : i64, scratch_operands = 0 : i64, tpu.core_type = #tpu.core_type<tc>, window_params = [{transform_indices = @transform_0, window_bounds = array<i64: 16, 64>}, {pipeline_mode = #tpu.pipeline_mode<synchronous>, transform_indices = @transform_1, window_bounds = array<i64: 64, 128>}, {pipeline_mode = #tpu.pipeline_mode<synchronous>, transform_indices = @transform_2, window_bounds = array<i64: 1, 128>}, {pipeline_mode = #tpu.pipeline_mode<synchronous>, transform_indices = @transform_3, window_bounds = array<i64: 128, 32>}, {pipeline_mode = #tpu.pipeline_mode<synchronous>, transform_indices = @transform_4, window_bounds = array<i64: 1, 32>}, {transform_indices = @transform_5, window_bounds = array<i64: 16, 32>}]} {
    %c0 = arith.constant 0 : index
    %c0_0 = arith.constant 0 : index
    %0 = vector.load %arg1[%c0, %c0_0] : memref<16x64xf32, #tpu.memory_space<vmem>>, vector<16x64xf32>
    %c0_1 = arith.constant 0 : index
    %c0_2 = arith.constant 0 : index
    %1 = vector.load %arg2[%c0_1, %c0_2] : memref<64x128xf32, #tpu.memory_space<vmem>>, vector<64x128xf32>
    %cst = arith.constant dense<0.000000e+00> : vector<16x128xf32>
    %2 = tpu.matmul %0, %1, %cst {dimension_numbers = #tpu.dot_dimension_numbers<[1], [0], [0], [1], [0, 0, 1, 1], [], []>} : vector<16x64xf32>, vector<64x128xf32>, vector<16x128xf32> -> vector<16x128xf32>
    %c0_3 = arith.constant 0 : index
    %c0_4 = arith.constant 0 : index
    %3 = vector.load %arg3[%c0_3, %c0_4] : memref<1x128xf32, #tpu.memory_space<vmem>>, vector<1x128xf32>
    %4 = vector.broadcast %3 : vector<1x128xf32> to vector<16x128xf32>
    %5 = arith.addf %2, %4 : vector<16x128xf32>
    %cst_5 = arith.constant 0.000000e+00 : f32
    %6 = vector.broadcast %cst_5 : f32 to vector<16x128xf32>
    %7 = arith.cmpf ogt, %5, %6 : vector<16x128xf32>
    %cst_6 = arith.constant 2.000000e-01 : f32
    %8 = vector.broadcast %cst_6 : f32 to vector<16x128xf32>
    %9 = arith.mulf %8, %5 : vector<16x128xf32>
    %10 = arith.select %7, %5, %9 : vector<16x128xi1>, vector<16x128xf32>
    %c0_7 = arith.constant 0 : index
    %c0_8 = arith.constant 0 : index
    %11 = vector.load %arg4[%c0_7, %c0_8] : memref<128x32xf32, #tpu.memory_space<vmem>>, vector<128x32xf32>
    %cst_9 = arith.constant dense<0.000000e+00> : vector<16x32xf32>
    %12 = tpu.matmul %10, %11, %cst_9 {dimension_numbers = #tpu.dot_dimension_numbers<[1], [0], [0], [1], [0, 0, 1, 1], [], []>} : vector<16x128xf32>, vector<128x32xf32>, vector<16x32xf32> -> vector<16x32xf32>
    %c0_10 = arith.constant 0 : index
    %c0_11 = arith.constant 0 : index
    %13 = vector.load %arg5[%c0_10, %c0_11] : memref<1x32xf32, #tpu.memory_space<vmem>>, vector<1x32xf32>
    %14 = vector.broadcast %13 : vector<1x32xf32> to vector<16x32xf32>
    %15 = arith.addf %12, %14 : vector<16x32xf32>
    %cst_12 = arith.constant 0.000000e+00 : f32
    %16 = vector.broadcast %cst_12 : f32 to vector<16x32xf32>
    %17 = arith.cmpf ogt, %15, %16 : vector<16x32xf32>
    %cst_13 = arith.constant 2.000000e-01 : f32
    %18 = vector.broadcast %cst_13 : f32 to vector<16x32xf32>
    %19 = arith.mulf %18, %15 : vector<16x32xf32>
    %20 = arith.select %17, %15, %19 : vector<16x32xi1>, vector<16x32xf32>
    %c0_14 = arith.constant 0 : index
    %c0_15 = arith.constant 0 : index
    %21 = vector.load %arg6[%c0_14, %c0_15] : memref<16x32xf32, #tpu.memory_space<vmem>>, vector<16x32xf32>
    tpu.vector_store %arg6[%c0_14, %c0_15], %20 {strides = array<i32>} : memref<16x32xf32, #tpu.memory_space<vmem>>, vector<16x32xf32>,
    return
  }
  func.func @transform_0(%arg0: i32) -> (i32, i32) {
    %c0_i32 = arith.constant 0 : i32
    %c0_i32_0 = arith.constant 0 : i32
    return %arg0, %c0_i32 : i32, i32
  }
  func.func @transform_1(%arg0: i32) -> (i32, i32) {
    %c0_i32 = arith.constant 0 : i32
    %c0_i32_0 = arith.constant 0 : i32
    %c0_i32_1 = arith.constant 0 : i32
    return %c0_i32, %c0_i32_0 : i32, i32
  }
  func.func @transform_2(%arg0: i32) -> (i32, i32) {
    %c0_i32 = arith.constant 0 : i32
    %c0_i32_0 = arith.constant 0 : i32
    %c0_i32_1 = arith.constant 0 : i32
    return %c0_i32, %c0_i32_0 : i32, i32
  }
  func.func @transform_3(%arg0: i32) -> (i32, i32) {
    %c0_i32 = arith.constant 0 : i32
    %c0_i32_0 = arith.constant 0 : i32
    %c0_i32_1 = arith.constant 0 : i32
    return %c0_i32, %c0_i32_0 : i32, i32
  }
  func.func @transform_4(%arg0: i32) -> (i32, i32) {
    %c0_i32 = arith.constant 0 : i32
    %c0_i32_0 = arith.constant 0 : i32
    %c0_i32_1 = arith.constant 0 : i32
    return %c0_i32, %c0_i32_0 : i32, i32
  }
  func.func @transform_5(%arg0: i32) -> (i32, i32) {
    %c0_i32 = arith.constant 0 : i32
    %c0_i32_0 = arith.constant 0 : i32
    return %arg0, %c0_i32 : i32, i32
  }
}

</mosaic_0001>

<bundles_post_ra>
// kernel: encoder_forward.1
= control target key start
LH: loop header
LB: loop body
LE: loop exit
PB: predicated region body
PF: predicated region fallthrough
CT: control target
= control target key end

     0   :  { %vm38_vm0 = vcmask 523264   ;;  %s482_s0 = inlined_call_operand.vmem [shape: f32[16,64], index: 0, kind: input, shape index: {}]   ;;  %s483_s1 = inlined_call_operand.vmem [shape: f32[64,128], index: 1, kind: input, shape index: {}]   ;;  %s484_s2 = inlined_call_operand.vmem [shape: f32[1,128], index: 2, kind: input, shape index: {}]   ;;  %s485_s3 = inlined_call_operand.vmem [shape: f32[128,32], index: 3, kind: input, shape index: {}]   ;;  %s486_s4 = inlined_call_operand.vmem [shape: f32[1,32], index: 4, kind: input, shape index: {}]   ;;  %s487_s5 = inlined_call_operand.hbm [shape: f32[16,32], index: 5, kind: output, shape index: {}]  }
   0x1   :  { %v30_v0 = vld [vmem:[%s483_s1 + $0x38] sm:$0xff]  ;;  %v29_v1 = vld [vmem:[%s483_s1 + $0x30] sm:$0xff]  ;;  %v28_v2 = vld [vmem:[%s483_s1 + $0x28] sm:$0xff] }
   0x2   :  { %281 = vmatprep.subr.mxu0 %v30_v0  ;;  %v21_v3 = vld [vmem:[%s482_s0] sm:$0xff]  ;;  %v141_v4 = vld [vmem:[%s485_s3 + $0x78] sm:$0xff]  ;;  %v140_v5 = vld [vmem:[%s485_s3 + $0x70] sm:$0xff] }
   0x3   :  { %282 = vmatpush3.msra.mxu0 %v30_v0  ;;  %297 = vmatprep.mubr.msk.f32.mxu0 %vm38_vm0, %v21_v3  ;;  %v27_v6 = vld [vmem:[%s483_s1 + $0x20] sm:$0xff]  ;;  %v139_v7 = vld [vmem:[%s485_s3 + $0x68] sm:$0xff]  ;;  %v26_v8 = vld [vmem:[%s483_s1 + $0x18] sm:$0xff] }
   0x4   :  { %283 = vmatprep.subr.mxu0 %v29_v1  ;;  %300 = vmatprep.subr.mxu1 %v141_v4  ;;  %v138_v9 = vld [vmem:[%s485_s3 + $0x60] sm:$0xff] }
   0x5   :  { %284 = vmatpush3.msra.mxu0 %v29_v1  ;;  %301 = vmatpush3.msra.mxu1 %v141_v4 }
   0x6   :  { %285 = vmatprep.subr.mxu0 %v28_v2  ;;  %302 = vmatprep.subr.mxu1 %v140_v5 }
   0x7   :  { %286 = vmatpush3.msra.mxu0 %v28_v2  ;;  %303 = vmatpush3.msra.mxu1 %v140_v5 }
   0x8   :  { %287 = vmatprep.subr.mxu0 %v27_v6 }
   0x9   :  { %10 = vsyncpa [#allocation3], 0  ;;  %288 = vmatpush3.msra.mxu0 %v27_v6  ;;  %v25_v10 = vld [vmem:[%s483_s1 + $0x10] sm:$0xff]  ;;  %304 = vmatprep.subr.mxu1 %v139_v7  ;;  %v137_v11 = vld [vmem:[%s485_s3 + $0x58] sm:$0xff]  ;;  %vm230_vm4 = vcmask 261120  }
   0xa   :  { %289 = vmatprep.subr.mxu0 %v26_v8  ;;  %305 = vmatpush3.msra.mxu1 %v139_v7  ;;  %v24_v12 = vld [vmem:[%s483_s1 + $0x8] sm:$0xff]  ;;  %v136_v13 = vld [vmem:[%s485_s3 + $0x50] sm:$0xff]  ;;  %v23_v14 = vld [vmem:[%s483_s1] sm:$0xff] }
   0xb   :  { %290 = vmatpush3.msra.mxu0 %v26_v8  ;;  %306 = vmatprep.subr.mxu1 %v138_v9  ;;  %v135_v15 = vld [vmem:[%s485_s3 + $0x48] sm:$0xff]  ;;  %v134_v17 = vld [vmem:[%s485_s3 + $0x40] sm:$0xff]  ;;  %v133_v18 = vld [vmem:[%s485_s3 + $0x38] sm:$0xff] }
   0xc   :  { %291 = vmatprep.subr.mxu0 %v25_v10  ;;  %307 = vmatpush3.msra.mxu1 %v138_v9  ;;  %v22_v16 = vld [vmem:[%s482_s0 + $0x8] sm:$0xff]  ;;  %v132_v19 = vld [vmem:[%s485_s3 + $0x30] sm:$0xff]  ;;  %v130_v21 = vld [vmem:[%s485_s3 + $0x20] sm:$0xff] }
   0xd   :  { %292 = vmatpush3.msra.mxu0 %v25_v10  ;;  %308 = vmatprep.subr.mxu1 %v137_v11  ;;  %v131_v20 = vld [vmem:[%s485_s3 + $0x28] sm:$0xff]  ;;  %v129_v22 = vld [vmem:[%s485_s3 + $0x18] sm:$0xff]  ;;  %v128_v23 = vld [vmem:[%s485_s3 + $0x10] sm:$0xff] }
   0xe   :  { %293 = vmatprep.subr.mxu0 %v24_v12  ;;  %309 = vmatpush3.msra.mxu1 %v137_v11  ;;  %v127_v24 = vld [vmem:[%s485_s3 + $0x8] sm:$0xff]  ;;  %v126_v25 = vld [vmem:[%s485_s3] sm:$0xff] }
   0xf   :  { %294 = vmatpush3.msra.mxu0 %v24_v12  ;;  %310 = vmatprep.subr.mxu1 %v136_v13  ;;  %v249_v26 = vld [vmem:[%s484_s2] ss:$0 sm:$0xff]  ;;  %s360_s2 = smov [#allocation2]  }
  0x10   :  { %295 = vmatprep.subr.mxu0 %v23_v14  ;;  %311 = vmatpush3.msra.mxu1 %v136_v13  ;;  %v252_v35 = vld [vmem:[%s486_s4] ss:$0 sm:$0xff]  ;;  %s238_s21 = sshll.u32 %s360_s2, 4  ;;  %s239_s21 = int_to_ptr.vmem [resolvable:$true] %s238_s21 }
  0x11   :  { %296 = vmatpush3.msra.mxu0 %v23_v14  ;;  %312 = vmatprep.subr.mxu1 %v135_v15  ;;  %s338_s22 = scalar_lea.vmem %s239_s21, 256  ;;  %p343_p1 = scmp.lt.s32.totalorder %s239_s21, %s239_s21 }
  0x12   :  { %298 = vmatmul.mubr.msk.f32.vlgmr.msra.gmra.mxu0 %vm38_vm0, %v22_v16  ;;  %313 = vmatpush3.msra.mxu1 %v135_v15  ;;  %p339_p0 = scmp.ne.s32.totalorder %s239_s21, %s338_s22  ;;  %p344_p2 = scmp.lt.s32.totalorder %s338_s22, %s338_s22 }
  0x13   :  { %314 = vmatprep.subr.mxu1 %v134_v17 }
  0x14   :  { %315 = vmatpush3.msra.mxu1 %v134_v17  ;;  %p345_p3 = por %p344_p2, %p343_p1 }
  0x15   :  { %316 = vmatprep.subr.mxu1 %v133_v18 }
  0x16   :  { %317 = vmatpush3.msra.mxu1 %v133_v18  ;;  %p346_p4 = pnand %p345_p3, %p339_p0 }
  0x17   :  { %318 = vmatprep.subr.mxu1 %v132_v19 }
  0x18   :  { %319 = vmatpush3.msra.mxu1 %v132_v19 }
  0x19   :  { %320 = vmatprep.subr.mxu1 %v131_v20 }
  0x1a   :  { %321 = vmatpush3.msra.mxu1 %v131_v20 }
  0x1b   :  { %322 = vmatprep.subr.mxu1 %v130_v21 }
  0x1c   :  { %323 = vmatpush3.msra.mxu1 %v130_v21 }
  0x1d   :  { %324 = vmatprep.subr.mxu1 %v129_v22 }
  0x1e   :  { %325 = vmatpush3.msra.mxu1 %v129_v22 }
  0x1f   :  { %326 = vmatprep.subr.mxu1 %v128_v23 }
  0x20   :  { %327 = vmatpush3.msra.mxu1 %v128_v23 }
  0x21   :  { %328 = vmatprep.subr.mxu1 %v127_v24 }
  0x22   :  { %329 = vmatpush3.msra.mxu1 %v127_v24 }
  0x23   :  { %330 = vmatprep.subr.mxu1 %v126_v25 }
  0x24   :  { %331 = vmatpush3.msra.mxu1 %v126_v25 }
  0xd2   :  { %v299_v27 = vpop.f32.mrf.mxu0 }
  0xd3   :  { %v117_v28 = vadd.f32 %v299_v27, %v249_v26 }
  0xd4   :  { %v111_v29 = vpop.f32.mrf.mxu0 }
  0xd5   :  { %v112_v30 = vadd.f32 %v249_v26, %v111_v29  ;;  %v123_v31 = vmul.f32 0.2, %v117_v28  ;;  %vm121_vm2 = vcmp.gt.f32.partialorder %v117_v28, 0.0 }
  0xd7   :  { %vm120_vm1 = vcmp.gt.f32.partialorder %v112_v30, 0.0  ;;  %v122_v32 = vmul.f32 0.2, %v112_v30  ;;  %v125_v34 = vsel %vm121_vm2, %v117_v28, %v123_v31 }
  0xd9   :  { %v124_v33 = vsel %vm120_vm1, %v112_v30, %v122_v32 }
  0xda   :  { %332 = vmatprep.mubr.f32.mxu1 %v124_v33 }
  0xdb   :  { %333 = vmatmul.mubr.f32.vlgmr.msra.gmra.mxu1 %v125_v34 }
 0x19b   :  { %v334_v36 = vpop.f32.mrf.mxu1 }
 0x19c   :  { %v221_v37 = vadd.f32 %v334_v36, %v252_v35 }
 0x19d   :  { %v215_v38 = vpop.f32.mrf.mxu1 }
 0x19e   :  { %vm225_vm3 = vcmp.gt.f32.partialorder %v221_v37, 0.0  ;;  %v227_v39 = vmul.f32 0.2, %v221_v37  ;;  %v216_v40 = vadd.f32 %v252_v35, %v215_v38 }
 0x1a0   :  { %v229_v41 = vsel %vm225_vm3, %v221_v37, %v227_v39  ;;  %vm224_vm5 = vcmp.gt.f32.partialorder %v216_v40, 0.0  ;;  %v226_v42 = vmul.f32 0.2, %v216_v40 }
 0x1a1   :  { %232 = vst.msk [vmem:[#allocation2 + $0x8] sm:$0xff] %vm230_vm4, %v229_v41 }
 0x1a2   :  { %v228_v43 = vsel %vm224_vm5, %v216_v40, %v226_v42 }
 0x1a3   :  { %231 = vst.msk [vmem:[#allocation2] sm:$0xff] %vm230_vm4, %v228_v43 }
 0x1a4   :  { %349 = shalt.err (!%p346_p4)
}
 0x1a5   :  { %s361_s4 = smov 128   ;;  %s362_s23 = smov 8  }
 0x1a6   :  { %244 = dma.vmem_to_hbm [thread:$0]  %s239_s21, 256, %s487_s5, [#allocation3], %s361_s4, %s361_s4, %s362_s23  }
 0x1a7   :  { %358 = dma.done.wait [#allocation3], 256  }
 0x1a8   :  { %359 = vsyncadd [#allocation3], 4294967040 }
 0x1a9   :  { %248 = vsyncpa [#allocation3], 1 }

</bundles_post_ra>
